<compile_context>
chip_gen: v7x
topology: tpu7x:2x2x1
jax: 0.10.0
libtpu: 0.0.40
codegen_flags: <defaults>
</compile_context>

<pallas_src>
import functools

import jax
import jax.numpy as jnp
from jax.experimental import pallas as pl
from jax.experimental.pallas import tpu as pltpu


# ------------------------------ fused kernel ------------------------------- #
def _crop_resize_kernel(wy_ref, wxT_ref, img_ref, out_ref):
    # wy_ref : (1, S, H)   f32  row-resample matrix for this crop
    # wxT_ref: (1, W, S)   f32  column-resample matrix (already transposed)
    # img_ref: (tn, H, W)  image dtype, native plane layout
    # out_ref: (1, tn, S, S)  out[k, n, s, t]
    tn, H, W = img_ref.shape
    S = wy_ref.shape[1]

    img = img_ref[...].astype(jnp.float32)                       # (tn, H, W)

    # 1) Column resize: contraction over W (lane dim).  Merging the leading
    #    (tn, H) dims is layout-free, so this is one big 2-D MXU matmul.
    u = jnp.dot(img.reshape(tn * H, W), wxT_ref[0],
                preferred_element_type=jnp.float32)              # (tn*H, S)
    u = u.reshape(tn, H, S)                                      # f32, stays in VMEM

    # 2) Row resize: batched matmul over the plane dim (contract H).
    wy_b = jnp.broadcast_to(wy_ref[0][None], (tn, S, H))
    o = jnp.einsum('nsh,nht->nst', wy_b, u,
                   preferred_element_type=jnp.float32)           # (tn, S, S)

    if jnp.issubdtype(out_ref.dtype, jnp.integer):
        info = jnp.iinfo(out_ref.dtype)
        o = jnp.clip(jnp.round(o), info.min, info.max)
    out_ref[0] = o.astype(out_ref.dtype)


# --------------------------- weight construction --------------------------- #
def _make_resize_weights(crop_start, crop_size, in_size, out_size):
    """Antialiased bilinear (triangle filter) resampling matrix (out_size, in_size)
    that reads only pixels inside [crop_start, crop_start + crop_size)."""
    crop_start_f = crop_start.astype(jnp.float32)
    crop_size_f = crop_size.astype(jnp.float32)
    scale = crop_size_f / float(out_size)
    support = jnp.maximum(scale, 1.0)          # antialias widens kernel when downscaling

    o = jnp.arange(out_size, dtype=jnp.float32)
    center = scale * (o + 0.5)                 # center in crop-local coords

    p = jnp.arange(in_size, dtype=jnp.float32)
    local = p[None, :] - crop_start_f          # crop-local pixel index, (out, in)
    dist = (local + 0.5 - center[:, None]) / support
    w = jnp.maximum(0.0, 1.0 - jnp.abs(dist))  # triangle filter
    in_crop = (local >= 0.0) & (local < crop_size_f)
    w = jnp.where(in_crop, w, 0.0)
    # boundary renormalization (aa path), eps-guarded against an all-masked row
    w = w / jnp.maximum(jnp.sum(w, axis=1, keepdims=True), 1e-6)
    return w


# ------------------------------- tiling glue -------------------------------- #
def _plane_vmem_bytes(H, W, S, img_itemsize, out_itemsize):
    """Estimated VMEM bytes per image plane in one grid step (incl. double buffers
    and the kernel's in-VMEM intermediates)."""
    img_blk = 2 * H * W * img_itemsize                 # double-buffered input block
    out_blk = 2 * S * S * out_itemsize                 # double-buffered output block
    img_f32 = H * W * 4 if img_itemsize != 4 else 0    # in-kernel cast copy
    u_f32 = H * S * 4                                  # column-resampled intermediate
    wy_b = S * H * 4                                   # broadcast row weights
    return img_blk + out_blk + img_f32 + u_f32 + wy_b


def _choose_plane_tile(n_planes, per_plane_bytes, fixed_bytes, budget_bytes):
    """Largest divisor of n_planes whose estimated VMEM footprint fits the budget.
    Always returns a valid divisor (>= 1) — never exceeds the budget by fallback."""
    best = 1
    for d in range(1, n_planes + 1):
        if n_planes % d:
            continue
        if fixed_bytes + d * per_plane_bytes <= budget_bytes:
            best = d
    return best


# ------------------------------- wrapper ----------------------------------- #
@functools.partial(jax.jit, static_argnames=("num_crop", "size", "factor"))
def multi_random_crop(image, key, num_crop=5, size=16, factor=2):
    """JAX/Pallas equivalent of MultiRandomCrop.forward for a batched NCHW tensor.

    Returns (num_crop, B, C, size//factor, size//factor) in image.dtype.
    """
    B, C, H, W = image.shape
    S = size // factor
    N = B * C
    K = num_crop

    # --- sample crop params (RandomResizedCrop, scale=(0.08,1.0), ratio=(1,1)) ---
    k_area, k_i, k_j = jax.random.split(key, 3)
    area = float(H * W)
    scale_s = jax.random.uniform(k_area, (K,), minval=0.08, maxval=1.0)
    side = jnp.clip(jnp.round(jnp.sqrt(area * scale_s)), 1, min(H, W)).astype(jnp.int32)
    u_i = jax.random.uniform(k_i, (K,))
    u_j = jax.random.uniform(k_j, (K,))
    top = jnp.floor(u_i * (H - side + 1).astype(jnp.float32)).astype(jnp.int32)
    left = jnp.floor(u_j * (W - side + 1).astype(jnp.float32)).astype(jnp.int32)
    # TODO(synk): exact torchvision RNG sequence (10-attempt rejection sampling) not reproduced.

    # --- per-crop separable resampling matrices (tiny, kept in f32) ---
    wy = jax.vmap(lambda st, sz: _make_resize_weights(st, sz, H, S))(top, side)    # (K,S,H)
    wx = jax.vmap(lambda st, sz: _make_resize_weights(st, sz, W, S))(left, side)   # (K,S,W)
    wxT = jnp.transpose(wx, (0, 2, 1))                                             # (K,W,S)

    # Native plane layout: metadata-only reshape, NO transpose/cast HBM pass.
    img = image.reshape(N, H, W)

    # --- generation-aware VMEM budget (v5e/v6e: 128 MiB, v7x: 64 MiB per TC) ---
    try:
        vmem_cap = int(pltpu.get_tpu_info().vmem_capacity_bytes)
    except Exception:
        vmem_cap = 64 * 1024 * 1024          # conservative fallback (v7x per-core VMEM)
    vmem_limit = min(int(vmem_cap * 0.85), vmem_cap - (4 << 20))
    block_budget = int(vmem_limit * 0.7)     # headroom for compiler-internal scratch

    img_itemsize = jnp.dtype(image.dtype).itemsize
    per_plane = _plane_vmem_bytes(H, W, S, img_itemsize, img_itemsize)
    fixed = 2 * (S * H + W * S) * 4          # double-buffered weight blocks (tiny)
    tn = _choose_plane_tile(N, per_plane, fixed, block_budget)

    # Crop axis innermost: the (tn, H, W) image block index only depends on the
    # plane axis, so it is fetched once and reused across all K crops.
    grid = (N // tn, K)

    out = pl.pallas_call(
        _crop_resize_kernel,
        out_shape=jax.ShapeDtypeStruct((K, N, S, S), image.dtype),
        grid=grid,
        in_specs=[
            pl.BlockSpec((1, S, H), lambda i, k: (k, 0, 0)),       # wy
            pl.BlockSpec((1, W, S), lambda i, k: (k, 0, 0)),       # wx^T
            pl.BlockSpec((tn, H, W), lambda i, k: (i, 0, 0)),      # image planes
        ],
        out_specs=pl.BlockSpec((1, tn, S, S), lambda i, k: (k, i, 0, 0)),
        compiler_params=pltpu.CompilerParams(
            # Plane axis "parallel" (shardable across v7x's two TCs, balanced),
            # crop axis "arbitrary" so it stays the inner sequential loop and the
            # image block is not re-fetched per crop.
            # TODO(synk): evaluate pltpu.CORE_PARALLEL on axis 0 for explicit v7x sharding.
            dimension_semantics=("parallel", "arbitrary"),
            vmem_limit_bytes=int(vmem_limit),
        ),
    )(wy, wxT, img)

    # out[k, n, s, t] is already in final element order: free view to (K,B,C,S,S).
    return out.reshape(K, B, C, S, S)


# --------------------------------- main ------------------------------------ #
if __name__ == "__main__":
    key = jax.random.PRNGKey(0)
    k_img, k_crop = jax.random.split(key)

    B, C, H, W = 2, 4, 16, 16
    num_crop, size, factor = 5, 16, 2     # output patches are (size//factor)^2 = 8x8

    image = jax.random.normal(k_img, (B, C, H, W), dtype=jnp.float32)

    out = multi_random_crop(image, k_crop, num_crop=num_crop, size=size, factor=factor)
    out = jax.block_until_ready(out)

    assert out.shape == (num_crop, B, C, size // factor, size // factor), out.shape
    assert out.dtype == image.dtype
    assert bool(jnp.all(jnp.isfinite(out)))
    print("KERNEL_OK")
</pallas_src>

<mosaic_0001>
module attributes {stable_mosaic.version = 11 : i64} {
  func.func @_crop_resize_kernel(%arg0: i32, %arg1: i32, %arg2: memref<1x8x16xf32, #tpu.memory_space<vmem>>, %arg3: memref<1x16x8xf32, #tpu.memory_space<vmem>>, %arg4: memref<8x16x16xf32, #tpu.memory_space<vmem>>, %arg5: memref<1x8x8x8xf32, #tpu.memory_space<vmem>>) attributes {dimension_semantics = [#tpu.dimension_semantics<parallel>, #tpu.dimension_semantics<arbitrary>], iteration_bounds = array<i64: 1, 5>, scalar_prefetch = 0 : i64, scratch_operands = 0 : i64, tpu.core_type = #tpu.core_type<tc>, window_params = [{transform_indices = @transform_0, window_bounds = array<i64: 1, 8, 16>}, {transform_indices = @transform_1, window_bounds = array<i64: 1, 16, 8>}, {transform_indices = @transform_2, window_bounds = array<i64: 8, 16, 16>}, {transform_indices = @transform_3, window_bounds = array<i64: 1, 8, 8, 8>}]} {
    %c0 = arith.constant 0 : index
    %c0_0 = arith.constant 0 : index
    %c0_1 = arith.constant 0 : index
    %0 = vector.load %arg4[%c0, %c0_0, %c0_1] : memref<8x16x16xf32, #tpu.memory_space<vmem>>, vector<8x16x16xf32>
    %1 = vector.shape_cast %0 : vector<8x16x16xf32> to vector<128x16xf32>
    %c0_2 = arith.constant 0 : index
    %c0_3 = arith.constant 0 : index
    %c0_4 = arith.constant 0 : index
    %2 = vector.load %arg3[%c0_2, %c0_3, %c0_4] : memref<1x16x8xf32, #tpu.memory_space<vmem>>, vector<1x16x8xf32>
    %3 = vector.shape_cast %2 : vector<1x16x8xf32> to vector<16x8xf32>
    %cst = arith.constant dense<0.000000e+00> : vector<128x8xf32>
    %4 = tpu.matmul %1, %3, %cst {dimension_numbers = #tpu.dot_dimension_numbers<[1], [0], [0], [1], [0, 0, 1, 1], [], []>} : vector<128x16xf32>, vector<16x8xf32>, vector<128x8xf32> -> vector<128x8xf32>
    %5 = vector.shape_cast %4 : vector<128x8xf32> to vector<8x16x8xf32>
    %c0_5 = arith.constant 0 : index
    %c0_6 = arith.constant 0 : index
    %c0_7 = arith.constant 0 : index
    %6 = vector.load %arg2[%c0_5, %c0_6, %c0_7] : memref<1x8x16xf32, #tpu.memory_space<vmem>>, vector<1x8x16xf32>
    %7 = vector.shape_cast %6 : vector<1x8x16xf32> to vector<8x16xf32>
    %8 = vector.shape_cast %7 : vector<8x16xf32> to vector<1x8x16xf32>
    %9 = vector.shape_cast %8 : vector<1x8x16xf32> to vector<1x8x16xf32>
    %10 = vector.broadcast %9 : vector<1x8x16xf32> to vector<8x8x16xf32>
    "tpu.trace_start"() <{level = 10 : i32, message = "nsh,nht->nst"}> : () -> ()
    %cst_8 = arith.constant dense<0.000000e+00> : vector<8x8x8xf32>
    %11 = tpu.matmul %10, %5, %cst_8 {dimension_numbers = #tpu.dot_dimension_numbers<[2], [1], [1], [2], [0, 0, 0, 1, 1, 2], [0], [0]>} : vector<8x8x16xf32>, vector<8x16x8xf32>, vector<8x8x8xf32> -> vector<8x8x8xf32>
    "tpu.trace_stop"() : () -> ()
    %c0_9 = arith.constant 0 : index
    %c0_10 = arith.constant 0 : index
    %c0_11 = arith.constant 0 : index
    %c0_12 = arith.constant 0 : index
    %12 = vector.load %arg5[%c0_9, %c0_10, %c0_11, %c0_12] : memref<1x8x8x8xf32, #tpu.memory_space<vmem>>, vector<1x8x8x8xf32>
    %13 = vector.shape_cast %12 : vector<1x8x8x8xf32> to vector<8x8x8xf32>
    %14 = vector.shape_cast %11 : vector<8x8x8xf32> to vector<1x8x8x8xf32>
    tpu.vector_store %arg5[%c0_9, %c0_10, %c0_11, %c0_12], %14 {strides = array<i32>} : memref<1x8x8x8xf32, #tpu.memory_space<vmem>>, vector<1x8x8x8xf32>,
    return
  }
  func.func @transform_0(%arg0: i32, %arg1: i32) -> (i32, i32, i32) {
    %c0_i32 = arith.constant 0 : i32
    %c0_i32_0 = arith.constant 0 : i32
    %c0_i32_1 = arith.constant 0 : i32
    return %arg1, %c0_i32, %c0_i32_0 : i32, i32, i32
  }
  func.func @transform_1(%arg0: i32, %arg1: i32) -> (i32, i32, i32) {
    %c0_i32 = arith.constant 0 : i32
    %c0_i32_0 = arith.constant 0 : i32
    %c0_i32_1 = arith.constant 0 : i32
    return %arg1, %c0_i32, %c0_i32_0 : i32, i32, i32
  }
  func.func @transform_2(%arg0: i32, %arg1: i32) -> (i32, i32, i32) {
    %c0_i32 = arith.constant 0 : i32
    %c0_i32_0 = arith.constant 0 : i32
    %c0_i32_1 = arith.constant 0 : i32
    return %arg0, %c0_i32, %c0_i32_0 : i32, i32, i32
  }
  func.func @transform_3(%arg0: i32, %arg1: i32) -> (i32, i32, i32, i32) {
    %c0_i32 = arith.constant 0 : i32
    %c0_i32_0 = arith.constant 0 : i32
    %c0_i32_1 = arith.constant 0 : i32
    return %arg1, %arg0, %c0_i32, %c0_i32_0 : i32, i32, i32, i32
  }
}

</mosaic_0001>

<bundles_post_ra>
// kernel: multi_random_crop.3
= control target key start
LH: loop header
LB: loop body
LE: loop exit
PB: predicated region body
PF: predicated region fallthrough
CT: control target
= control target key end

     0   :  { %8 = vsyncpa [#allocation3], 0  ;;  %s1702_s0 = inlined_call_operand.vmem [shape: f32[5,8,16], index: 0, kind: input, shape index: {}]   ;;  %s1703_s1 = inlined_call_operand.vmem [shape: f32[5,16,8], index: 1, kind: input, shape index: {}]   ;;  %s1704_s2 = inlined_call_operand.vmem [shape: f32[8,16,16], index: 2, kind: input, shape index: {}]   ;;  %s1705_s3 = inlined_call_operand.hbm [shape: f32[5,8,8,8], index: 3, kind: output, shape index: {}]  }
   0x1   :  { %10 = vsyncpa [#allocation3 + $0x1], 0  ;;  %s1488_s12 = smov 0   ;;  %s1490_s13 = smov 0  }
   0x2   :  { %s1492_s14 = smov 0   ;;  %s1494_s15 = smov 0  }
   0x3   :  { %s1496_s16 = smov 0   ;;  %s1498_s17 = smov 0  }
   0x4 LB: > { %s1127_s18 = sadd.s32 4294967295, %s1460_s17   ;;  %s1128_s19 = sadd.s32 4294967294, %s1460_s17   ;;  %s1460_s17 = sphi %s1498_s17, %s16_s17   ;;  %s1456_s16 = sphi %s1496_s16, %s1712_s16   ;;  %s1452_s15 = sphi %s1494_s15, %s1711_s15   ;;  %s1448_s14 = sphi %s1492_s14, %s1710_s14   ;;  %s1444_s13 = sphi %s1490_s13, %s1709_s13   ;;  %s1440_s12 = sphi %s1488_s12, %s1708_s12  }
   0x5   : > { %s25_s20 = sadd.s32 1, %s1456_s16  ;;  %s115_s21 = sadd.s32 1, %s1448_s14 }
   0x6   : > { %p26_p0 = scmp.ge.s32.totalorder %s25_s20, 5  ;;  %p125_p1 = scmp.ne.s32.totalorder %s1448_s14, %s1444_s13 }
   0x7   : > { %p126_p2 = scmp.eq.s32.totalorder %s1127_s18, 4  ;;  %p131_p3 = scmp.ne.s32.totalorder %s1444_s13, %s1440_s12 }
   0x8   : > { %s1714_s20 = smov (%p26_p0, %s25_s20), 0  ;;  %p132_p5 = scmp.eq.s32.totalorder %s1128_s19, 4 }
   0x9   : > { %p1528_p4 = por %p126_p2, %p125_p1  ;;  %s110_s23 = ssub.s32 %s1456_s16, %s1714_s20 }
   0xa   : > { %p1132_p6 = scmp.ge.s32.totalorder %s1460_s17, 1  ;;  %p113_p7 = scmp.eq.s32.totalorder %s110_s23, 0 }
   0xb   : > { %p1535_p8 = por %p132_p5, %p131_p3  ;;  %p175_p9 = scmp.lt.s32.totalorder %s1460_s17, 6 }
   0xc   : > { %s1541_s25 = scalar_select %p113_p7, %s1448_s14, %s115_s21  }
   0xd   : > { %p176_p10 = pnand %p1132_p6, %p175_p9 }
   0xe   : > { %p209_p11 = scmp.lt.s32.totalorder (!%p176_p10), %s1452_s15, 4  ;;  %v226_v0 = vld [vmem:[%s1704_s2] sm:$0xff] (!%p176_p10)  ;;  %vm244_vm0 = vcmask (!%p176_p10), 130048   ;;  %v227_v4 = vld [vmem:[%s1704_s2 + $0x8] sm:$0xff] (!%p176_p10)  ;;  %v228_v5 = vld [vmem:[%s1704_s2 + $0x10] sm:$0xff] (!%p176_p10)  ;;  %v1462_v19 = vmov (!%p176_p10), 0.0|0.0  }
   0xf   : > { %179 = sbr.rel (%p176_p10) target bundleno = 506 (0x1fa), region = 32  ;;  %1214 = vmatprep.mubr.msk.f32.mxu0 (!%p176_p10), %vm244_vm0, %v226_v0  ;;  %v229_v6 = vld [vmem:[%s1704_s2 + $0x18] sm:$0xff] (!%p176_p10)  ;;  %v230_v7 = vld [vmem:[%s1704_s2 + $0x20] sm:$0xff] (!%p176_p10)  ;;  %v231_v8 = vld [vmem:[%s1704_s2 + $0x28] sm:$0xff] (!%p176_p10)  ;;  %1298 = vmatprep.subr.bf16.mxu1 (!%p176_p10), %v1462_v19  ;;  %vm1463_vm1 = vmmov (!%p176_p10), 0   ;;  %v1464_v20 = vmov (!%p176_p10), 0.0  }
  0x10   : > { %v232_v9 = vld [vmem:[%s1704_s2 + $0x30] sm:$0xff] (!%p176_p10)  ;;  %v233_v10 = vld [vmem:[%s1704_s2 + $0x38] sm:$0xff] (!%p176_p10)  ;;  %v234_v11 = vld [vmem:[%s1704_s2 + $0x40] sm:$0xff] (!%p176_p10)  ;;  %1242 = vmatprep.mubr.msk.f32.mxu1 (!%p176_p10), %vm1463_vm1, %v1464_v20  ;;  %vm1002_vm2 = vcmask (!%p176_p10), 64512   ;;  %s1167_s10 = sshll.u32 (!%p176_p10), %s1452_s15, 10  ;;  %s1465_s26 = smov (!%p176_p10), [#allocation2]  }
  0x11   : > { %v235_v12 = vld [vmem:[%s1704_s2 + $0x48] sm:$0xff] (!%p176_p10)  ;;  %v236_v13 = vld [vmem:[%s1704_s2 + $0x50] sm:$0xff] (!%p176_p10)  ;;  %v237_v14 = vld [vmem:[%s1704_s2 + $0x58] sm:$0xff] (!%p176_p10)  ;;  %s1649_s21 = scalar_lea.hbm (!%p176_p10), %s1705_s3, %s1167_s10  ;;  %s1386_s27 = sshll.u32 (!%p176_p10), %s1465_s26, 4  ;;  %s1387_s27 = int_to_ptr.vmem [resolvable:$false] %s1386_s27 }
  0x12   : > { %v238_v15 = vld [vmem:[%s1704_s2 + $0x60] sm:$0xff] (!%p176_p10)  ;;  %v239_v16 = vld [vmem:[%s1704_s2 + $0x68] sm:$0xff] (!%p176_p10)  ;;  %v240_v17 = vld [vmem:[%s1704_s2 + $0x70] sm:$0xff] (!%p176_p10) }
  0x13   : > { %v241_v18 = vld [vmem:[%s1704_s2 + $0x78] sm:$0xff] (!%p176_p10) }
  0x16   : > { %s1549_s28 = scalar_select %p209_p11, %s1452_s15, 4 }
  0x18   : > { %s1166_s29 = sshll.u32 %s1549_s28, 4  ;;  %s1134_s4 = sshll.u32 %s1549_s28, 3 }
  0x19   : > { %s217_s5 = scalar_lea.vmem %s1703_s1, %s1166_s29  ;;  %s212_s7 = scalar_lea.vmem %s1702_s0, %s1134_s4 }
  0x1a   : > { %v242_v1 = vld [vmem:[%s217_s5] sm:$0xff]  ;;  %v243_v2 = vld [vmem:[%s217_s5 + $0x8] sm:$0xff]  ;;  %s206_s28 = sand.u32 1, %s1444_s13   ;;  %s1388_s29 = scalar_lea.vmem %s1387_s27, 2048 }
  0x1b   : > { %v1294_v3 = vpack.c.bf16 %v243_v2, %v242_v1  ;;  %v438_v24 = vld [vmem:[%s212_s7] sm:$0xff]  ;;  %s1133_s8 = sshll.u32 %s206_s28, 6  ;;  %s1656_s15 = scalar_lea.sflag [#allocation3], %s206_s28 }
  0x1c   : > { %s208_s9 = scalar_lea.vmem [#allocation2], %s1133_s8 }
  0x1d   : > { %1295 = vmatprep.subr.bf16.mxu0 %v1294_v3  ;;  %s1027_s11 = sshll.u32 %s208_s9, 4  ;;  %s1651_s11 = int_to_ptr.vmem [resolvable:$true] %s1027_s11 }
  0x1e   : > { %1297 = vmatpush3.bf16.msra.mxu0 %v1294_v3  ;;  %s1382_s23 = scalar_lea.vmem %s1651_s11, 1024  ;;  %p1389_p1 = scmp.lt.s32.totalorder %s1651_s11, %s1387_s27 }
  0x1f   : > { %p1383_p12 = scmp.ne.s32.totalorder %s1651_s11, %s1382_s23  ;;  %p1390_p2 = scmp.lt.s32.totalorder %s1388_s29, %s1382_s23 }
  0x21   : > { %1215 = vmatmul.mubr.msk.f32.vlgmr.msra.gmra.mrb[0].mxu0 %vm244_vm0, %v227_v4  ;;  %p1384_p13 = pnand %p1383_p12, %p1528_p4  ;;  %p1391_p3 = por %p1390_p2, %p1389_p1 }
  0x22   : > { %1217 = vmatprep.mubr.msk.f32.mxu0 %vm244_vm0, %v228_v5 }
  0x23   : > { %p1385_p0 = pneg %p1384_p13 }
  0x25   : > { %1218 = vmatmul.mubr.msk.f32.gmra.mrb[2].mxu0 %vm244_vm0, %v229_v6  ;;  %p1392_p5 = pnand %p1391_p3, %p1385_p0 }
  0x26   : > { %1220 = vmatprep.mubr.msk.f32.mxu0 %vm244_vm0, %v230_v7 }
  0x29   : > { %1221 = vmatmul.mubr.msk.f32.gmra.mrb[4].mxu0 %vm244_vm0, %v231_v8 }
  0x2a   : > { %1223 = vmatprep.mubr.msk.f32.mxu0 %vm244_vm0, %v232_v9 }
  0x2d   : > { %1224 = vmatmul.mubr.msk.f32.gmra.mrb[6].mxu0 %vm244_vm0, %v233_v10 }
  0x2e   : > { %1226 = vmatprep.mubr.msk.f32.mxu0 %vm244_vm0, %v234_v11 }
  0x31   : > { %1227 = vmatmul.mubr.msk.f32.gmra.mrb[8].mxu0 %vm244_vm0, %v235_v12 }
  0x32   : > { %1229 = vmatprep.mubr.msk.f32.mxu0 %vm244_vm0, %v236_v13 }
  0x35   : > { %1230 = vmatmul.mubr.msk.f32.gmra.mrb[10].mxu0 %vm244_vm0, %v237_v14 }
  0x36   : > { %1232 = vmatprep.mubr.msk.f32.mxu0 %vm244_vm0, %v238_v15 }
  0x39   : > { %1233 = vmatmul.mubr.msk.f32.gmra.mrb[12].mxu0 %vm244_vm0, %v239_v16 }
  0x3a   : > { %1235 = vmatprep.mubr.msk.f32.mxu0 %vm244_vm0, %v240_v17 }
  0x3d   : > { %1236 = vmatmul.mubr.msk.f32.gmra.mrb[14].mxu0 %vm244_vm0, %v241_v18 }
  0xf4   : > { %v1216_v21 = vpop.f32.mrb[0].mxu0 }
  0xf5   : > { %v359_v22 = vpop.f32.mrb[1].mxu0 }
  0xf6   : > { %v1299_v23 = vpack.c.bf16 %v1216_v21, %v359_v22 }
  0xf8   : > { %v1219_v25 = vpop.f32.mrb[2].mxu0  ;;  %1300 = vmatpush3.bf16.msra.mxu1 %v1299_v23 }
  0xf9   : > { %v369_v26 = vpop.f32.mrb[3].mxu0  ;;  %1301 = vmatprep.subr.bf16.mxu1 %v1462_v19 }
  0xfa   : > { %v1302_v27 = vpack.c.bf16 %v1219_v25, %v369_v26 }
  0xfb   : > { %1243 = vmatmul.mubr.msk.f32.vlgmr.msra.gmra.mrb[0].mxu1 %vm244_vm0, %v438_v24 }
  0xfc   : > { %v1222_v28 = vpop.f32.mrb[4].mxu0  ;;  %1303 = vmatpush3.bf16.msra.mxu1 %v1302_v27  ;;  %1249 = vmatprep.mubr.msk.f32.mxu1 %vm1463_vm1, %v1464_v20 }
  0xfd   : > { %v379_v29 = vpop.f32.mrb[5].mxu0  ;;  %1304 = vmatprep.subr.bf16.mxu1 %v1462_v19 }
  0xfe   : > { %v1305_v30 = vpack.c.bf16 %v1222_v28, %v379_v29 }
  0xff   : > { %1250 = vmatmul.mubr.msk.f32.vlgmr.msra.gmra.mrb[2].mxu1 %vm244_vm0, %v438_v24 }
 0x100   : > { %v1225_v31 = vpop.f32.mrb[6].mxu0  ;;  %1306 = vmatpush3.bf16.msra.mxu1 %v1305_v30  ;;  %1256 = vmatprep.mubr.msk.f32.mxu1 %vm1463_vm1, %v1464_v20 }
 0x101   : > { %v389_v32 = vpop.f32.mrb[7].mxu0  ;;  %1307 = vmatprep.subr.bf16.mxu1 %v1462_v19 }
 0x102   : > { %v1308_v33 = vpack.c.bf16 %v1225_v31, %v389_v32 }
 0x103   : > { %1257 = vmatmul.mubr.msk.f32.vlgmr.msra.gmra.mrb[4].mxu1 %vm244_vm0, %v438_v24 }
 0x104   : > { %v1228_v34 = vpop.f32.mrb[8].mxu0  ;;  %1309 = vmatpush3.bf16.msra.mxu1 %v1308_v33  ;;  %1263 = vmatprep.mubr.msk.f32.mxu1 %vm1463_vm1, %v1464_v20 }
 0x105   : > { %v399_v35 = vpop.f32.mrb[9].mxu0  ;;  %1310 = vmatprep.subr.bf16.mxu1 %v1462_v19 }
 0x106   : > { %v1311_v36 = vpack.c.bf16 %v1228_v34, %v399_v35 }
 0x107   : > { %1264 = vmatmul.mubr.msk.f32.vlgmr.msra.gmra.mrb[6].mxu1 %vm244_vm0, %v438_v24 }
 0x108   : > { %v1231_v37 = vpop.f32.mrb[10].mxu0  ;;  %1312 = vmatpush3.bf16.msra.mxu1 %v1311_v36  ;;  %1270 = vmatprep.mubr.msk.f32.mxu1 %vm1463_vm1, %v1464_v20 }
 0x109   : > { %v409_v38 = vpop.f32.mrb[11].mxu0  ;;  %1313 = vmatprep.subr.bf16.mxu1 %v1462_v19 }
 0x10a   : > { %v1314_v39 = vpack.c.bf16 %v1231_v37, %v409_v38 }
 0x10b   : > { %1271 = vmatmul.mubr.msk.f32.vlgmr.msra.gmra.mrb[8].mxu1 %vm244_vm0, %v438_v24 }
 0x10c   : > { %v1234_v40 = vpop.f32.mrb[12].mxu0  ;;  %1315 = vmatpush3.bf16.msra.mxu1 %v1314_v39  ;;  %1277 = vmatprep.mubr.msk.f32.mxu1 %vm1463_vm1, %v1464_v20 }
 0x10d   : > { %v419_v41 = vpop.f32.mrb[13].mxu0  ;;  %1316 = vmatprep.subr.bf16.mxu1 %v1462_v19 }
 0x10e   : > { %v1317_v42 = vpack.c.bf16 %v1234_v40, %v419_v41 }
 0x10f   : > { %1278 = vmatmul.mubr.msk.f32.vlgmr.msra.gmra.mrb[10].mxu1 %vm244_vm0, %v438_v24 }
 0x110   : > { %v1237_v43 = vpop.f32.mrb[14].mxu0  ;;  %1318 = vmatpush3.bf16.msra.mxu1 %v1317_v42  ;;  %1284 = vmatprep.mubr.msk.f32.mxu1 %vm1463_vm1, %v1464_v20 }
 0x111   : > { %v429_v44 = vpop.f32.mrb[15].mxu0  ;;  %1319 = vmatprep.subr.bf16.mxu1 %v1462_v19 }
 0x112   : > { %v1320_v45 = vpack.c.bf16 %v1237_v43, %v429_v44 }
 0x113   : > { %1285 = vmatmul.mubr.msk.f32.vlgmr.msra.gmra.mrb[12].mxu1 %vm244_vm0, %v438_v24 }
 0x114   : > { %1321 = vmatpush3.bf16.msra.mxu1 %v1320_v45  ;;  %1291 = vmatprep.mubr.msk.f32.mxu1 %vm1463_vm1, %v1464_v20 }
 0x117   : > { %1292 = vmatmul.mubr.msk.f32.vlgmr.msra.gmra.mrb[14].mxu1 %vm244_vm0, %v438_v24 }
 0x1ce   : > { %v508_v46 = vpop.f32.mrb[0].mxu1 }
 0x1cf   : > { %1003 = vst.msk [vmem:[%s208_s9] sm:$0xff] %vm1002_vm2, %v508_v46  ;;  %v1244_v47 = vpop.f32.mrb[1].mxu1 }
 0x1d2   : > { %v578_v48 = vpop.f32.mrb[2].mxu1 }
 0x1d3   : > { %1004 = vst.msk [vmem:[%s208_s9 + $0x8] sm:$0xff] %vm1002_vm2, %v578_v48  ;;  %v1251_v49 = vpop.f32.mrb[3].mxu1 }
 0x1d6   : > { %v648_v50 = vpop.f32.mrb[4].mxu1 }
 0x1d7   : > { %1005 = vst.msk [vmem:[%s208_s9 + $0x10] sm:$0xff] %vm1002_vm2, %v648_v50  ;;  %v1258_v51 = vpop.f32.mrb[5].mxu1 }
 0x1da   : > { %v718_v52 = vpop.f32.mrb[6].mxu1 }
 0x1db   : > { %1006 = vst.msk [vmem:[%s208_s9 + $0x18] sm:$0xff] %vm1002_vm2, %v718_v52  ;;  %v1265_v53 = vpop.f32.mrb[7].mxu1 }
 0x1de   : > { %v788_v54 = vpop.f32.mrb[8].mxu1 }
 0x1df   : > { %1007 = vst.msk [vmem:[%s208_s9 + $0x20] sm:$0xff] %vm1002_vm2, %v788_v54  ;;  %v1272_v55 = vpop.f32.mrb[9].mxu1 }
 0x1e2   : > { %v858_v56 = vpop.f32.mrb[10].mxu1 }
 0x1e3   : > { %1008 = vst.msk [vmem:[%s208_s9 + $0x28] sm:$0xff] %vm1002_vm2, %v858_v56  ;;  %v1279_v57 = vpop.f32.mrb[11].mxu1 }
 0x1e6   : > { %v928_v58 = vpop.f32.mrb[12].mxu1 }
 0x1e7   : > { %1009 = vst.msk [vmem:[%s208_s9 + $0x30] sm:$0xff] %vm1002_vm2, %v928_v58  ;;  %v1286_v59 = vpop.f32.mrb[13].mxu1 }
 0x1ea   : > { %v998_v60 = vpop.f32.mrb[14].mxu1 }
 0x1eb   : > { %1010 = vst.msk [vmem:[%s208_s9 + $0x38] sm:$0xff] %vm1002_vm2, %v998_v60  ;;  %v1293_v61 = vpop.f32.mrb[15].mxu1 }
 0x1ec   : > { %1395 = shalt.err (!%p1392_p5)
}
 0x1ed   : > { %s1396_s30 = scalar_lea.hbm %s1649_s21, 1024  ;;  %s1400_s6 = scalar_lea.hbm %s1705_s3, 5120 }
 0x1ee   : > { %p1397_p6 = scmp.ne.s32.totalorder %s1649_s21, %s1396_s30  ;;  %p1401_p10 = scmp.lt.u32.totalorder %s1649_s21, %s1705_s3 }
 0x1ef   : > { %p1402_p11 = scmp.lt.u32.totalorder %s1400_s6, %s1396_s30  ;;  %p1404_p13 = scmp.lt.u32.totalorder %s1396_s30, %s1649_s21 }
 0x1f0   : > { %p1398_p7 = pnand %p1397_p6, %p1528_p4 }
 0x1f1   : > { %p1403_p12 = por %p1402_p11, %p1401_p10 }
 0x1f2   : > { %p1399_p9 = pneg %p1398_p7 }
 0x1f3   : > { %p1405_p0 = por %p1404_p13, %p1403_p12 }
 0x1f5   : > { %p1406_p1 = pnand %p1405_p0, %p1399_p9 }
 0x1f7   : > { %1409 = shalt.err (!%p1406_p1)
}
 0x1f8   : > { %s1466_s8 = smov 128   ;;  %s1467_s9 = smov 8  }
 0x1f9   : > { %1322 = dma.vmem_to_hbm [thread:$0]  (%p1528_p4), %s1651_s11, 1024, %s1649_s21, %s1656_s15, %s1466_s8, %s1466_s8, %s1467_s9  }
 0x1fa PF: > { %p1328_p2 = scmp.ge.s32.totalorder %s1460_s17, 2  ;;  %s1042_s10 = sand.u32 1, %s1440_s12  }
 0x1fb   : > { %s1043_s18 = scalar_lea.sflag [#allocation3], %s1042_s10 }
 0x1fc   : > { %p1325_p3 = pnand %p1328_p2, %p1535_p8 }
 0x1fe   : > { %1435 = dma.done.wait (!%p1325_p3), %s1043_s18, 1024  }
 0x1ff   : > { %1437 = vsyncadd (!%p1325_p3), %s1043_s18, 4294966272  ;;  %s16_s17 = sadd.s32 1, %s1460_s17   ;;  %s1708_s12 = smov %s1444_s13 }
 0x200   : > { %p13_p5 = scmp.ge.s32.totalorder %s16_s17, 7   ;;  %s1709_s13 = smov %s1448_s14 }
 0x201   : > { %s1710_s14 = smov %s1541_s25  ;;  %s1711_s15 = smov %s1456_s16 }
 0x202   : > { %s1712_s16 = smov %s1714_s20  ;;  %15 = sbr.rel (!%p13_p5) target bundleno = 4 (0x4), region = 73 }
 0x209   :  { %1048 = vsyncpa [#allocation3], 1 }
 0x20a   :  { %1050 = vsyncpa [#allocation3 + $0x1], 1 }

</bundles_post_ra>
